<compile_context>
chip_gen: v7x
topology: tpu7x:2x2x1
jax: 0.10.0
libtpu: 0.0.40
codegen_flags: <defaults>
</compile_context>

<pallas_src>
import functools

import jax
import jax.numpy as jnp
from jax.experimental import pallas as pl
from jax.experimental.pallas import tpu as pltpu


def _round_up(x: int, m: int) -> int:
    return ((x + m - 1) // m) * m


# --------------------------------------------------------------------------- #
# Kernel
# --------------------------------------------------------------------------- #
def _fc_kernel(idx_ref, h1_ref, w2_ref, b2_ref, w3_ref, b3_ref, o_ref, *,
               vocab_pad: int, out_dim: int, apply_softmax: bool):
    tm = idx_ref.shape[0]

    # Embedding + layer1 + tanh fused: lane-dense one-hot @ precomputed bf16 table.
    idx = idx_ref[...]                                               # (TM, 1) int32
    iota = jax.lax.broadcasted_iota(jnp.int32, (tm, vocab_pad), 1)   # (TM, Vp)
    onehot = (iota == idx).astype(jnp.bfloat16)                      # exact 0/1
    h = jnp.dot(onehot, h1_ref[...], preferred_element_type=jnp.float32)  # (TM, H)
    # dropout (p=0.1) -> identity in eval mode

    # layer2 + tanh (bf16 matmul inputs, f32 accumulate / bias / tanh).
    h = jnp.tanh(
        jnp.dot(h.astype(jnp.bfloat16), w2_ref[...],
                preferred_element_type=jnp.float32) + b2_ref[...])
    # dropout (p=0.1) -> identity in eval mode

    # layer3 (output lanes padded to a 128 multiple -> unmasked lane-dense stores).
    out = jnp.dot(h.astype(jnp.bfloat16), w3_ref[...],
                  preferred_element_type=jnp.float32) + b3_ref[...]

    if apply_softmax:  # mode == 'actor'
        out_pad = o_ref.shape[-1]
        if out_pad != out_dim:
            lane = jax.lax.broadcasted_iota(jnp.int32, (tm, out_pad), 1)
            out = jnp.where(lane < out_dim, out, jnp.float32(-1e30))
        m = jnp.max(out, axis=-1, keepdims=True)
        e = jnp.exp(out - m)
        # Exact normalization: rows sum to 1 within f32 rounding.
        out = e / jnp.sum(e, axis=-1, keepdims=True)

    o_ref[...] = out.astype(o_ref.dtype)


# --------------------------------------------------------------------------- #
# One-time parameter preparation (hoisted out of the hot path)
# --------------------------------------------------------------------------- #
def prepare_params(params, *, num_stops: int):
    emb, w1, b1, w2, b2, w3, b3 = params
    E = emb.shape[1]
    H = w1.shape[1]
    out_dim = w3.shape[1]
    vocab_pad = _round_up(num_stops, 128)
    out_pad = _round_up(out_dim, 128)

    # Fold emb -> layer1 -> tanh into a single bf16 lookup table.
    h1 = jnp.tanh(emb.astype(jnp.float32) @ w1.astype(jnp.float32)
                  + b1.astype(jnp.float32).reshape(1, H))
    h1_tab = jnp.zeros((vocab_pad, H), jnp.bfloat16).at[:num_stops].set(
        h1.astype(jnp.bfloat16))

    w2_b = w2.astype(jnp.bfloat16)
    b2_f = b2.astype(jnp.float32).reshape(1, H)
    w3_p = jnp.zeros((H, out_pad), jnp.bfloat16).at[:, :out_dim].set(
        w3.astype(jnp.bfloat16))
    b3_p = jnp.zeros((1, out_pad), jnp.float32).at[:, :out_dim].set(
        b3.astype(jnp.float32).reshape(1, out_dim))

    return dict(h1_tab=h1_tab, w2=w2_b, b2=b2_f, w3=w3_p, b3=b3_p,
                vocab_pad=vocab_pad, out_pad=out_pad, out_dim=out_dim, hidden=H)


# --------------------------------------------------------------------------- #
# Forward
# --------------------------------------------------------------------------- #
def fc_forward(idx, prep, *, mode: str = "normal", tm: int = 512,
               out_dtype=jnp.float32):
    """idx: (B, S) int token indices. Returns (B, S, out_dim) in out_dtype."""
    B, S = idx.shape
    M = B * S
    H = prep["hidden"]
    vocab_pad = prep["vocab_pad"]
    out_pad = prep["out_pad"]
    out_dim = prep["out_dim"]

    # Row tiling: multiple of 8; cap so grid_m >= 2 when possible (v7x megacore).
    m8 = _round_up(max(M, 1), 8)
    tm_eff = min(tm, m8)
    if m8 >= 16:
        tm_eff = min(tm_eff, _round_up((m8 + 1) // 2, 8))
    tm_eff = _round_up(tm_eff, 8)
    m_pad = _round_up(m8, tm_eff)
    grid_m = m_pad // tm_eff

    idx_flat = jnp.pad(idx.reshape(M).astype(jnp.int32),
                       (0, m_pad - M)).reshape(m_pad, 1)

    apply_softmax = (mode == "actor")
    kernel = functools.partial(_fc_kernel, vocab_pad=vocab_pad, out_dim=out_dim,
                               apply_softmax=apply_softmax)

    # Weights / biases: constant index_map -> VMEM-resident, DMA'd once.
    def const_spec(shape):
        return pl.BlockSpec(shape, lambda i: tuple(0 for _ in shape))

    flops = 2 * m_pad * (vocab_pad * H + H * H + H * out_pad)
    transcendentals = m_pad * (H + (out_pad if apply_softmax else 0))
    bytes_accessed = (
        idx_flat.size * 4
        + (prep["h1_tab"].size + prep["w2"].size + prep["w3"].size) * 2
        + (prep["b2"].size + prep["b3"].size) * 4
        + m_pad * out_pad * jnp.dtype(out_dtype).itemsize)
    cost = pl.CostEstimate(flops=flops, transcendentals=transcendentals,
                           bytes_accessed=bytes_accessed)

    out = pl.pallas_call(
        kernel,
        out_shape=jax.ShapeDtypeStruct((m_pad, out_pad), out_dtype),
        grid_spec=pltpu.PrefetchScalarGridSpec(
            num_scalar_prefetch=0,
            grid=(grid_m,),
            in_specs=[
                pl.BlockSpec((tm_eff, 1), lambda i: (i, 0)),   # idx tile
                const_spec(prep["h1_tab"].shape),
                const_spec(prep["w2"].shape), const_spec(prep["b2"].shape),
                const_spec(prep["w3"].shape), const_spec(prep["b3"].shape),
            ],
            out_specs=pl.BlockSpec((tm_eff, out_pad), lambda i: (i, 0)),
        ),
        compiler_params=pltpu.CompilerParams(dimension_semantics=("parallel",)),
        cost_estimate=cost,
    )(idx_flat, prep["h1_tab"], prep["w2"], prep["b2"], prep["w3"], prep["b3"])

    return out[:M, :out_dim].reshape(B, S, out_dim)


# --------------------------------------------------------------------------- #
# Params + reference
# --------------------------------------------------------------------------- #
def init_params(key, num_stops=100, embedded_dim=32, hidden_dim=64,
                output_dim=100, mode="normal"):
    if mode == "critic":
        output_dim = 1
    ks = jax.random.split(key, 7)
    s = 0.05
    emb = jax.random.normal(ks[0], (num_stops, embedded_dim), jnp.float32) * s
    # Linear weights stored as (in, out) = PyTorch weight.T
    w1 = jax.random.normal(ks[1], (embedded_dim, hidden_dim), jnp.float32) * s
    b1 = jax.random.normal(ks[2], (1, hidden_dim), jnp.float32) * s
    w2 = jax.random.normal(ks[3], (hidden_dim, hidden_dim), jnp.float32) * s
    b2 = jax.random.normal(ks[4], (1, hidden_dim), jnp.float32) * s
    w3 = jax.random.normal(ks[5], (hidden_dim, output_dim), jnp.float32) * s
    b3 = jax.random.normal(ks[6], (1, output_dim), jnp.float32) * s
    return (emb, w1, b1, w2, b2, w3, b3)


def _ref_forward(idx, params, softmax=False):
    """Pure-JAX reference mirroring the kernel's precision path (bf16 tables)."""
    emb, w1, b1, w2, b2, w3, b3 = params
    H = w1.shape[1]
    h1_tab = jnp.tanh(emb @ w1 + b1.reshape(1, H)).astype(jnp.bfloat16)
    h = jnp.take(h1_tab, idx.reshape(-1), axis=0).astype(jnp.float32)
    h = jnp.tanh(jnp.dot(h.astype(jnp.bfloat16), w2.astype(jnp.bfloat16),
                         preferred_element_type=jnp.float32) + b2.reshape(1, -1))
    o = jnp.dot(h.astype(jnp.bfloat16), w3.astype(jnp.bfloat16),
                preferred_element_type=jnp.float32) + b3.reshape(1, -1)
    if softmax:
        o = jax.nn.softmax(o, axis=-1)
    return o.reshape(idx.shape + (o.shape[-1],))


if __name__ == "__main__":
    key = jax.random.PRNGKey(0)
    pkey, ckey, xkey = jax.random.split(key, 3)

    num_stops, embedded_dim, hidden_dim, output_dim = 100, 32, 64, 100
    B, S = 2, 8
    x = jax.random.randint(xkey, (B, S), 0, num_stops, dtype=jnp.int32)

    # --- normal mode ---
    params = init_params(pkey, num_stops, embedded_dim, hidden_dim, output_dim, "normal")
    prep = prepare_params(params, num_stops=num_stops)       # one-time prep
    y = jax.block_until_ready(fc_forward(x, prep, mode="normal"))
    ref = _ref_forward(x, params, softmax=False)
    assert y.shape == (B, S, output_dim)
    assert jnp.allclose(y, ref, atol=2e-3, rtol=2e-2), "normal-mode mismatch"

    # --- actor mode (exercises masked-lane softmax with exact normalization) ---
    ya = jax.block_until_ready(fc_forward(x, prep, mode="actor"))
    refa = _ref_forward(x, params, softmax=True)
    assert jnp.allclose(ya, refa, atol=2e-3, rtol=2e-2), "actor-mode mismatch"
    assert jnp.allclose(jnp.sum(ya, axis=-1), 1.0, atol=1e-3), "softmax rows don't sum to 1"

    # --- critic mode (output_dim = 1, exercises heavy lane padding 1 -> 128) ---
    cparams = init_params(ckey, num_stops, embedded_dim, hidden_dim, output_dim, "critic")
    cprep = prepare_params(cparams, num_stops=num_stops)
    yc = jax.block_until_ready(fc_forward(x, cprep, mode="critic"))
    refc = _ref_forward(x, cparams, softmax=False)
    assert yc.shape == (B, S, 1)
    assert jnp.allclose(yc, refc, atol=2e-3, rtol=2e-2), "critic-mode mismatch"

    print("KERNEL_OK")
</pallas_src>

<mosaic_0001>
module attributes {stable_mosaic.version = 11 : i64} {
  func.func @_fc_kernel(%arg0: i32, %arg1: memref<8x1xi32, #tpu.memory_space<vmem>>, %arg2: memref<128x64xbf16, #tpu.memory_space<vmem>>, %arg3: memref<64x64xbf16, #tpu.memory_space<vmem>>, %arg4: memref<1x64xf32, #tpu.memory_space<vmem>>, %arg5: memref<64x128xbf16, #tpu.memory_space<vmem>>, %arg6: memref<1x128xf32, #tpu.memory_space<vmem>>, %arg7: memref<8x128xf32, #tpu.memory_space<vmem>>) attributes {dimension_semantics = [#tpu.dimension_semantics<parallel>], iteration_bounds = array<i64: 2>, scalar_prefetch = 0 : i64, scratch_operands = 0 : i64, tpu.core_type = #tpu.core_type<tc>, window_params = [{transform_indices = @transform_0, window_bounds = array<i64: 8, 1>}, {pipeline_mode = #tpu.pipeline_mode<synchronous>, transform_indices = @transform_1, window_bounds = array<i64: 128, 64>}, {pipeline_mode = #tpu.pipeline_mode<synchronous>, transform_indices = @transform_2, window_bounds = array<i64: 64, 64>}, {pipeline_mode = #tpu.pipeline_mode<synchronous>, transform_indices = @transform_3, window_bounds = array<i64: 1, 64>}, {pipeline_mode = #tpu.pipeline_mode<synchronous>, transform_indices = @transform_4, window_bounds = array<i64: 64, 128>}, {pipeline_mode = #tpu.pipeline_mode<synchronous>, transform_indices = @transform_5, window_bounds = array<i64: 1, 128>}, {transform_indices = @transform_6, window_bounds = array<i64: 8, 128>}]} {
    %c0 = arith.constant 0 : index
    %c0_0 = arith.constant 0 : index
    %0 = vector.load %arg1[%c0, %c0_0] : memref<8x1xi32, #tpu.memory_space<vmem>>, vector<8x1xi32>
    %1 = tpu.iota {dimensions = array<i32: 1>} : vector<8x128xi32>
    %2 = vector.broadcast %0 : vector<8x1xi32> to vector<8x128xi32>
    %3 = arith.cmpi eq, %1, %2 : vector<8x128xi32>
    %4 = arith.extui %3 : vector<8x128xi1> to vector<8x128xi32>
    %5 = arith.sitofp %4 : vector<8x128xi32> to vector<8x128xf32>
    %6 = arith.truncf %5 : vector<8x128xf32> to vector<8x128xbf16>
    %c0_1 = arith.constant 0 : index
    %c0_2 = arith.constant 0 : index
    %7 = vector.load %arg2[%c0_1, %c0_2] : memref<128x64xbf16, #tpu.memory_space<vmem>>, vector<128x64xbf16>
    %cst = arith.constant dense<0.000000e+00> : vector<8x64xf32>
    %8 = tpu.matmul %6, %7, %cst {dimension_numbers = #tpu.dot_dimension_numbers<[1], [0], [0], [1], [0, 0, 1, 1], [], []>} : vector<8x128xbf16>, vector<128x64xbf16>, vector<8x64xf32> -> vector<8x64xf32>
    %9 = arith.truncf %8 : vector<8x64xf32> to vector<8x64xbf16>
    %c0_3 = arith.constant 0 : index
    %c0_4 = arith.constant 0 : index
    %10 = vector.load %arg3[%c0_3, %c0_4] : memref<64x64xbf16, #tpu.memory_space<vmem>>, vector<64x64xbf16>
    %cst_5 = arith.constant dense<0.000000e+00> : vector<8x64xf32>
    %11 = tpu.matmul %9, %10, %cst_5 {dimension_numbers = #tpu.dot_dimension_numbers<[1], [0], [0], [1], [0, 0, 1, 1], [], []>} : vector<8x64xbf16>, vector<64x64xbf16>, vector<8x64xf32> -> vector<8x64xf32>
    %c0_6 = arith.constant 0 : index
    %c0_7 = arith.constant 0 : index
    %12 = vector.load %arg4[%c0_6, %c0_7] : memref<1x64xf32, #tpu.memory_space<vmem>>, vector<1x64xf32>
    %13 = vector.broadcast %12 : vector<1x64xf32> to vector<8x64xf32>
    %14 = arith.addf %11, %13 : vector<8x64xf32>
    %15 = math.tanh %14 : vector<8x64xf32>
    %16 = arith.truncf %15 : vector<8x64xf32> to vector<8x64xbf16>
    %c0_8 = arith.constant 0 : index
    %c0_9 = arith.constant 0 : index
    %17 = vector.load %arg5[%c0_8, %c0_9] : memref<64x128xbf16, #tpu.memory_space<vmem>>, vector<64x128xbf16>
    %cst_10 = arith.constant dense<0.000000e+00> : vector<8x128xf32>
    %18 = tpu.matmul %16, %17, %cst_10 {dimension_numbers = #tpu.dot_dimension_numbers<[1], [0], [0], [1], [0, 0, 1, 1], [], []>} : vector<8x64xbf16>, vector<64x128xbf16>, vector<8x128xf32> -> vector<8x128xf32>
    %c0_11 = arith.constant 0 : index
    %c0_12 = arith.constant 0 : index
    %19 = vector.load %arg6[%c0_11, %c0_12] : memref<1x128xf32, #tpu.memory_space<vmem>>, vector<1x128xf32>
    %20 = vector.broadcast %19 : vector<1x128xf32> to vector<8x128xf32>
    %21 = arith.addf %18, %20 : vector<8x128xf32>
    %c0_13 = arith.constant 0 : index
    %c0_14 = arith.constant 0 : index
    %22 = vector.load %arg7[%c0_13, %c0_14] : memref<8x128xf32, #tpu.memory_space<vmem>>, vector<8x128xf32>
    tpu.vector_store %arg7[%c0_13, %c0_14], %21 {strides = array<i32>} : memref<8x128xf32, #tpu.memory_space<vmem>>, vector<8x128xf32>,
    return
  }
  func.func @transform_0(%arg0: i32) -> (i32, i32) {
    %c0_i32 = arith.constant 0 : i32
    %c0_i32_0 = arith.constant 0 : i32
    return %arg0, %c0_i32 : i32, i32
  }
  func.func @transform_1(%arg0: i32) -> (i32, i32) {
    %c0_i32 = arith.constant 0 : i32
    %c0_i32_0 = arith.constant 0 : i32
    %c0_i32_1 = arith.constant 0 : i32
    return %c0_i32, %c0_i32_0 : i32, i32
  }
  func.func @transform_2(%arg0: i32) -> (i32, i32) {
    %c0_i32 = arith.constant 0 : i32
    %c0_i32_0 = arith.constant 0 : i32
    %c0_i32_1 = arith.constant 0 : i32
    return %c0_i32, %c0_i32_0 : i32, i32
  }
  func.func @transform_3(%arg0: i32) -> (i32, i32) {
    %c0_i32 = arith.constant 0 : i32
    %c0_i32_0 = arith.constant 0 : i32
    %c0_i32_1 = arith.constant 0 : i32
    return %c0_i32, %c0_i32_0 : i32, i32
  }
  func.func @transform_4(%arg0: i32) -> (i32, i32) {
    %c0_i32 = arith.constant 0 : i32
    %c0_i32_0 = arith.constant 0 : i32
    %c0_i32_1 = arith.constant 0 : i32
    return %c0_i32, %c0_i32_0 : i32, i32
  }
  func.func @transform_5(%arg0: i32) -> (i32, i32) {
    %c0_i32 = arith.constant 0 : i32
    %c0_i32_0 = arith.constant 0 : i32
    %c0_i32_1 = arith.constant 0 : i32
    return %c0_i32, %c0_i32_0 : i32, i32
  }
  func.func @transform_6(%arg0: i32) -> (i32, i32) {
    %c0_i32 = arith.constant 0 : i32
    %c0_i32_0 = arith.constant 0 : i32
    return %arg0, %c0_i32 : i32, i32
  }
}

</mosaic_0001>

<bundles_post_ra>
// kernel: tpu_custom_call.1
= control target key start
LH: loop header
LB: loop body
LE: loop exit
PB: predicated region body
PF: predicated region fallthrough
CT: control target
= control target key end

     0   :  { %11 = vsyncpa [#allocation3], 0  ;;  %s1044_s0 = inlined_call_operand.vmem [shape: s32[16,1], index: 0, kind: input, shape index: {}]   ;;  %s1045_s1 = inlined_call_operand.vmem [shape: bf16[128,64], index: 1, kind: input, shape index: {}]   ;;  %s1046_s2 = inlined_call_operand.vmem [shape: bf16[64,64], index: 2, kind: input, shape index: {}]   ;;  %s1047_s3 = inlined_call_operand.vmem [shape: f32[1,64], index: 3, kind: input, shape index: {}]   ;;  %s1048_s4 = inlined_call_operand.vmem [shape: bf16[64,128], index: 4, kind: input, shape index: {}]   ;;  %s1049_s5 = inlined_call_operand.vmem [shape: f32[1,128], index: 5, kind: input, shape index: {}]   ;;  %s1050_s6 = inlined_call_operand.hbm [shape: f32[16,128], index: 6, kind: output, shape index: {}]  }
   0x1   :  { %13 = vsyncpa [#allocation3 + $0x1], 0  ;;  %s866_s21 = smov 0   ;;  %s868_s22 = smov 0  }
   0x2   :  { %s870_s23 = smov 0   ;;  %s872_s24 = smov 0  }
   0x3 LB: > { %s887_s25 = sadd.s32 4294967295, %s824_s24   ;;  %s604_s26 = sadd.s32 4294967294, %s824_s24   ;;  %s824_s24 = sphi %s872_s24, %s1056_s24   ;;  %s820_s23 = sphi %s870_s23, %s1055_s23   ;;  %s816_s22 = sphi %s868_s22, %s1054_s22   ;;  %s812_s21 = sphi %s866_s21, %s1053_s21  }
   0x4   : > { %s891_s27 = sadd.s32 1, %s824_s24   ;;  %s157_s28 = sadd.s32 1, %s820_s23 }
   0x5   : > { %s154_s29 = ssub.s32 %s824_s24, %s891_s27  ;;  %p167_p0 = scmp.ne.s32.totalorder %s820_s23, %s816_s22 }
   0x6   : > { %p155_p1 = scmp.eq.s32.totalorder %s154_s29, 0  ;;  %p168_p2 = scmp.eq.s32.totalorder %s887_s25, 1 }
   0x7   : > { %p173_p3 = scmp.ne.s32.totalorder %s816_s22, %s812_s21  ;;  %p174_p4 = scmp.eq.s32.totalorder %s604_s26, 1 }
   0x8   : > { %s902_s30 = scalar_select %p155_p1, %s820_s23, %s157_s28  }
   0x9   : > { %p904_p5 = por %p168_p2, %p167_p0  ;;  %p908_p6 = por %p174_p4, %p173_p3 }
   0xa   : > { %p607_p7 = scmp.ge.s32.totalorder %s824_s24, 1  ;;  %p214_p8 = scmp.lt.s32.totalorder %s824_s24, 3 }
   0xc   : > { %p215_p9 = pnand %p607_p7, %p214_p8 }
   0xd   : > { %p243_p10 = scmp.lt.s32.totalorder (!%p215_p9), %s887_s25, 1  ;;  %v744_v0 = vld [vmem:[%s1045_s1] sm:$0xff] (!%p215_p9)   ;;  %v826_v1 = vmov (!%p215_p9), 0   ;;  %v827_v2 = vmov (!%p215_p9), 0.0   ;;  %v745_v3 = vld [vmem:[%s1045_s1 + $0x8] sm:$0xff] (!%p215_p9)   ;;  %v746_v5 = vld [vmem:[%s1045_s1 + $0x10] sm:$0xff] (!%p215_p9)   ;;  %v249_v14 = vlaneseq (!%p215_p9) }
   0xe   : > { %218 = sbr.rel (%p215_p9) target bundleno = 825 (0x339), region = 44  ;;  %743 = vset.pattern.permute.xlu0 (!%p215_p9), %v826_v1  ;;  %656 = vmatprep.subr.bf16.mxu0 (!%p215_p9), %v827_v2  ;;  %vm828_vm0 = vmmov (!%p215_p9), 0   ;;  %v752_v6 = vld [vmem:[%s1046_s2] sm:$0xff] (!%p215_p9)   ;;  %v747_v7 = vld [vmem:[%s1045_s1 + $0x18] sm:$0xff] (!%p215_p9)   ;;  %v753_v8 = vld [vmem:[%s1046_s2 + $0x8] sm:$0xff] (!%p215_p9)   ;;  %vm402_vm3 = vcmask (!%p215_p9), 523264  }
   0xf   : > { %657 = vmatpush3.bf16.msra.mxu0 (!%p215_p9), %v744_v0  ;;  %676 = vmatprep.subr.bf16.mxu1 (!%p215_p9), %v827_v2  ;;  %v748_v9 = vld [vmem:[%s1045_s1 + $0x20] sm:$0xff] (!%p215_p9)   ;;  %v754_v10 = vld [vmem:[%s1046_s2 + $0x10] sm:$0xff] (!%p215_p9)   ;;  %v749_v11 = vld [vmem:[%s1045_s1 + $0x28] sm:$0xff] (!%p215_p9)   ;;  %v250_v15 = vand.u32 (!%p215_p9), 127, %v249_v14  ;;  %v829_v17 = vmov (!%p215_p9), 1.0|1.0  }
  0x10   : > { %658 = vmatprep.subr.bf16.mxu0 (!%p215_p9), %v827_v2  ;;  %672 = vmatprep.mubr.msk.bf16.mxu0 (!%p215_p9), %vm828_vm0, %v827_v2  ;;  %v750_v12 = vld [vmem:[%s1045_s1 + $0x30] sm:$0xff] (!%p215_p9)   ;;  %v751_v13 = vld [vmem:[%s1045_s1 + $0x38] sm:$0xff] (!%p215_p9)   ;;  %v756_v24 = vld [vmem:[%s1048_s4] sm:$0xff] (!%p215_p9)   ;;  %s240_s18 = sand.u32 (!%p215_p9), 1, %s816_s22   ;;  %s634_s28 = sshll.u32 (!%p215_p9), %s887_s25, 7 }
  0x11   : > { %684 = vmatprep.mubr.msk.bf16.mxu1 (!%p215_p9), %vm828_vm0, %v827_v2  ;;  %677 = vmatpush3.bf16.msra.mxu1 (!%p215_p9), %v752_v6  ;;  %v755_v18 = vld [vmem:[%s1046_s2 + $0x18] sm:$0xff] (!%p215_p9)   ;;  %v757_v25 = vld [vmem:[%s1048_s4 + $0x8] sm:$0xff] (!%p215_p9)   ;;  %v758_v26 = vld [vmem:[%s1048_s4 + $0x10] sm:$0xff] (!%p215_p9)   ;;  %s608_s19 = sshll.u32 (!%p215_p9), %s240_s18, 3  ;;  %s1002_s12 = scalar_lea.hbm (!%p215_p9), %s1050_s6, %s634_s28 }
  0x12   : > { %678 = vmatprep.subr.bf16.mxu1 (!%p215_p9), %v827_v2  ;;  %v759_v27 = vld [vmem:[%s1048_s4 + $0x18] sm:$0xff] (!%p215_p9)   ;;  %v621_v28 = vld [vmem:[%s1047_s3] ss:$0 sm:$0xff] (!%p215_p9)  ;;  %s242_s29 = scalar_lea.vmem (!%p215_p9), [#allocation2], %s608_s19  ;;  %s532_s13 = scalar_lea.sflag (!%p215_p9), [#allocation3], %s240_s18 }
  0x13   : > { %659 = vmatpush3.bf16.msra.mxu0 (!%p215_p9), %v745_v3  ;;  %v627_v36 = vld [vmem:[%s1049_s5] ss:$0 sm:$0xff] (!%p215_p9)  ;;  %s545_s9 = sshll.u32 (!%p215_p9), %s242_s29, 4  ;;  %s1004_s9 = int_to_ptr.vmem [resolvable:$true] %s545_s9 }
  0x14   : > { %660 = vmatprep.subr.bf16.mxu0 (!%p215_p9), %v827_v2 }
  0x15   : > { %s244_s11 = scalar_select %p243_p10, %s887_s25, 1  ;;  %679 = vmatpush3.bf16.msra.mxu1 %v753_v8 }
  0x16   : > { %680 = vmatprep.subr.bf16.mxu1 %v827_v2  ;;  %s762_s25 = scalar_lea.vmem %s1004_s9, 128 }
  0x17   : > { %s609_s14 = sshll.u32 %s244_s11, 3  ;;  %661 = vmatpush3.bf16.msra.mxu0 %v746_v5  ;;  %p763_p11 = scmp.ne.s32.totalorder %s1004_s9, %s762_s25 }
  0x18   : > { %s246_s17 = scalar_lea.vmem %s1044_s0, %s609_s14  ;;  %662 = vmatprep.subr.bf16.mxu0 %v827_v2  ;;  %s830_s14 = smov [#allocation2]  }
  0x19   : > { %v248_v4 = vld [vmem:[%s246_s17] sm:$0xff]  ;;  %681 = vmatpush3.bf16.msra.mxu1 %v754_v10  ;;  %p764_p12 = pnand %p763_p11, %p904_p5  ;;  %s766_s15 = sshll.u32 %s830_s14, 4  ;;  %s767_s15 = int_to_ptr.vmem [resolvable:$false] %s766_s15 }
  0x1a   : > { %252 = vperm.xlu0 %743, %v248_v4   ;;  %682 = vmatprep.subr.bf16.mxu1 %v827_v2  ;;  %s768_s16 = scalar_lea.vmem %s767_s15, 256  ;;  %p769_p0 = scmp.lt.s32.totalorder %s1004_s9, %s767_s15 }
  0x1b   : > { %663 = vmatpush3.bf16.msra.mxu0 %v747_v7  ;;  %p765_p13 = pneg %p764_p12  ;;  %p770_p1 = scmp.lt.s32.totalorder %s768_s16, %s762_s25 }
  0x1c   : > { %664 = vmatprep.subr.bf16.mxu0 %v827_v2 }
  0x1d   : > { %683 = vmatpush3.bf16.msra.mxu1 %v755_v18  ;;  %p771_p2 = por %p770_p1, %p769_p0 }
  0x1e   : > { %688 = vmatprep.subr.bf16.mxu1 %v827_v2 }
  0x1f   : > { %665 = vmatpush3.bf16.msra.mxu0 %v748_v9  ;;  %p772_p3 = pnand %p771_p2, %p765_p13 }
  0x20   : > { %666 = vmatprep.subr.bf16.mxu0 %v827_v2 }
  0x23   : > { %667 = vmatpush3.bf16.msra.mxu0 %v749_v11 }
  0x24   : > { %668 = vmatprep.subr.bf16.mxu0 %v827_v2 }
  0x27   : > { %669 = vmatpush3.bf16.msra.mxu0 %v750_v12 }
  0x28   : > { %670 = vmatprep.subr.bf16.mxu0 %v827_v2 }
  0x2b   : > { %671 = vmatpush3.bf16.msra.mxu0 %v751_v13 }
  0x99   : > { %v253_v16 = vpop.permute.xlu0 %252 }
  0x9a   : > { %vm254_vm1 = vcmp.eq.s32.totalorder %v250_v15, %v253_v16 }
  0x9b   : > { %vm619_vm2 = vmpackc.low %vm254_vm1, %vm254_vm1 }
  0x9c   : > { %673 = vmatmul.mubr.msk.bf16.vlgmr.msra.gmra.mrb[0].mxu0 %vm619_vm2, %v829_v17 }
 0x16f   : > { %v356_v19 = vpop.f32.mrb[0].mxu0 }
 0x170   : > { %v362_v20 = vpack.c.bf16 %v356_v19, %v356_v19  ;;  %v674_v21 = vpop.f32.mrb[1].mxu0 }
 0x171   : > { %v359_v22 = vpop.f32.mrb[2].mxu0 }
 0x172   : > { %v675_v23 = vpop.f32.mrb[3].mxu0  ;;  %685 = vmatmul.mubr.msk.bf16.vlgmr.msra.gmra.mrb[0].mxu1 %vm402_vm3, %v362_v20 }
 0x173   : > { %696 = vmatprep.mubr.msk.bf16.mxu1 %vm828_vm0, %v827_v2  ;;  %689 = vmatpush3.bf16.msra.mxu1 %v756_v24 }
 0x174   : > { %690 = vmatprep.subr.bf16.mxu1 %v827_v2 }
 0x177   : > { %691 = vmatpush3.bf16.msra.mxu1 %v757_v25 }
 0x178   : > { %692 = vmatprep.subr.bf16.mxu1 %v827_v2 }
 0x17b   : > { %693 = vmatpush3.bf16.msra.mxu1 %v758_v26 }
 0x17c   : > { %694 = vmatprep.subr.bf16.mxu1 %v827_v2 }
 0x17f   : > { %695 = vmatpush3.bf16.msra.mxu1 %v759_v27 }
 0x245   : > { %v440_v29 = vpop.f32.mrb[0].mxu1 }
 0x246   : > { %v441_v30 = vadd.f32 %v621_v28, %v440_v29  ;;  %v686_v31 = vpop.f32.mrb[1].mxu1 }
 0x247   : > { %v443_v32 = vpop.f32.mrb[2].mxu1 }
 0x248   : > { %760 = vtanh.f32 %v441_v30  ;;  %v687_v33 = vpop.f32.mrb[3].mxu1 }
 0x252   : > { %v761_v34 = vpop.eup %760 }
 0x253   : > { %v447_v35 = vpack.c.bf16 %v761_v34, %v761_v34 }
 0x255   : > { %697 = vmatmul.mubr.msk.bf16.vlgmr.msra.gmra.mrb[4].mxu1 %vm402_vm3, %v447_v35 }
 0x328   : > { %v524_v37 = vpop.f32.mrb[4].mxu1 }
 0x329   : > { %v525_v38 = vadd.f32 %v627_v36, %v524_v37  ;;  %v698_v39 = vpop.f32.mrb[5].mxu1 }
 0x32a   : > { %v527_v40 = vpop.f32.mrb[6].mxu1 }
 0x32b   : > { %530 = vst [vmem:[%s242_s29] sm:$0xff] %v525_v38  ;;  %v699_v41 = vpop.f32.mrb[7].mxu1 }
 0x32c   : > { %775 = shalt.err (!%p772_p3)
}
 0x32d   : > { %s776_s17 = scalar_lea.hbm %s1002_s12, 128  ;;  %s780_s20 = scalar_lea.hbm %s1050_s6, 256 }
 0x32e   : > { %p777_p4 = scmp.ne.s32.totalorder %s1002_s12, %s776_s17  ;;  %p781_p9 = scmp.lt.u32.totalorder %s1002_s12, %s1050_s6 }
 0x32f   : > { %p782_p10 = scmp.lt.u32.totalorder %s780_s20, %s776_s17  ;;  %p784_p12 = scmp.lt.u32.totalorder %s776_s17, %s1002_s12 }
 0x330   : > { %p778_p7 = pnand %p777_p4, %p904_p5 }
 0x331   : > { %p783_p11 = por %p782_p10, %p781_p9 }
 0x332   : > { %p779_p8 = pneg %p778_p7 }
 0x333   : > { %p785_p13 = por %p784_p12, %p783_p11 }
 0x335   : > { %p786_p0 = pnand %p785_p13, %p779_p8 }
 0x337   : > { %789 = shalt.err (!%p786_p0)
}
 0x338   : > { %700 = dma.vmem_to_hbm [thread:$0]  (%p904_p5), %s1004_s9, 128, %s1002_s12, %s532_s13  }
 0x339 PF: > { %p706_p1 = scmp.ge.s32.totalorder %s824_s24, 2  ;;  %s557_s29 = sand.u32 1, %s812_s21  }
 0x33a   : > { %s558_s10 = scalar_lea.sflag [#allocation3], %s557_s29 }
 0x33b   : > { %p703_p2 = pnand %p706_p1, %p908_p6 }
 0x33d   : > { %807 = dma.done.wait (!%p703_p2), %s558_s10, 128  }
 0x33e   : > { %809 = vsyncadd (!%p703_p2), %s558_s10, 4294967168  ;;  %p16_p3 = scmp.ge.s32.totalorder %s891_s27, 4   ;;  %s1053_s21 = smov %s816_s22 }
 0x33f   : > { %s1054_s22 = smov %s820_s23  ;;  %s1055_s23 = smov %s902_s30 }
 0x340   : > { %s1056_s24 = smov %s891_s27  ;;  %18 = sbr.rel (!%p16_p3) target bundleno = 3 (0x3), region = 79 }
 0x347   :  { %563 = vsyncpa [#allocation3], 1 }
 0x348   :  { %565 = vsyncpa [#allocation3 + $0x1], 1 }

</bundles_post_ra>
